<compile_context>
chip_gen: v6e
topology: v6e:2x2x1
jax: 0.10.0
libtpu: 0.0.40
codegen_flags: <defaults>
</compile_context>

<pallas_src>
import functools

import jax
import jax.numpy as jnp
from jax.experimental import pallas as pl
from jax.experimental.pallas import tpu as pltpu


def _round_up(x, m):
    return ((x + m - 1) // m) * m


# ----------------------------- Pallas kernel ------------------------------- #
def _ctl_kernel(rank_num, n_valid, n_pad,
                rank_mean_ref,   # SMEM  f32[rank_num]
                q_ref,           # VMEM  [TB, H]   (f32 or bf16)
                featT_ref,       # VMEM  [H,  TN]  (pre-transposed RHS)
                sim_ref,         # out   f32[TB, TN]  raw sample_sim tile
                pred_ref,        # out   i8 [TB, TN]  map_scores_to_ranks
                dist_ref,        # out   i8 [TB, TN]  cts_sim_dist
                rowmax_ref):     # out   f32[TB, 1]   per-row max (resident over N)
    j = pl.program_id(1)         # candidate (N) tile

    # sample_sim = sent_q @ all_feature.T ; RHS already [H, TN] -> MXU-native.
    sim = jax.lax.dot_general(
        q_ref[...], featT_ref[...],
        dimension_numbers=(((1,), (0,)), ((), ())),
        preferred_element_type=jnp.float32)
    tb, tn = sim.shape
    sim_ref[...] = sim

    # running per-row max over valid (unpadded) columns; rowmax block is the
    # same for every j -> accumulator pattern, init on the first N tile.
    @pl.when(j == 0)
    def _():
        rowmax_ref[...] = jnp.full_like(rowmax_ref, -jnp.inf)

    if n_valid < n_pad:
        # Padding columns live only in the LAST N tile; interior tiles skip
        # the iota / compare / select / -inf broadcast entirely.
        last_j = pl.num_programs(1) - 1

        @pl.when(j == last_j)
        def _():
            col = jax.lax.broadcasted_iota(jnp.int32, (tb, tn), 1) + j * tn
            masked = jnp.where(col < n_valid, sim, -jnp.inf)
            rowmax_ref[...] = jnp.maximum(
                rowmax_ref[...], jnp.max(masked, axis=1, keepdims=True))

        @pl.when(j != last_j)
        def _():
            rowmax_ref[...] = jnp.maximum(
                rowmax_ref[...], jnp.max(sim, axis=1, keepdims=True))
    else:
        rowmax_ref[...] = jnp.maximum(
            rowmax_ref[...], jnp.max(sim, axis=1, keepdims=True))

    # map_scores_to_ranks: argmin_r |sim - rank_mean[r]|, first index on ties
    # (matches torch.argmin).  r = 0 peeled; rank_num small & static;
    # best_d tracked with jnp.minimum (upd select only needed for best_i).
    best_d = jnp.abs(sim - rank_mean_ref[0])
    best_i = jnp.zeros((tb, tn), jnp.int32)
    for r in range(1, rank_num):
        d = jnp.abs(sim - rank_mean_ref[r])
        best_i = jnp.where(d < best_d, jnp.int32(r), best_i)
        best_d = jnp.minimum(best_d, d)
    pred_ref[...] = best_i.astype(jnp.int8)

    # cts_sim_dist: floor((sim + 1) / 2 * rank_num), constants folded (FMA).
    half_rank = jnp.float32(0.5 * rank_num)
    dist_ref[...] = (jnp.floor(sim * half_rank + half_rank)
                     .astype(jnp.int32).astype(jnp.int8))


def emma_ctl_pallas(sent_q, featT, rank_mean, rank_num, *,
                    use_bf16_matmul=True, tb=None, tn=None,
                    vmem_limit_bytes=48 * 1024 * 1024):
    """sent_q: [BS, H] f32, featT: [H, N] f32 (already transposed features)."""
    bs, h = sent_q.shape
    n = featT.shape[1]

    # Lane-dense outputs: pad the candidate axis UP to a multiple of the
    # target tile (never shrink the tile for awkward queue sizes).  In
    # production choose BS + K a multiple of the tile so n_pad == n and the
    # slices below are free.
    if tn is None:
        tn = min(512, _round_up(n, 128))
    n_pad = _round_up(n, tn)
    if n_pad != n:
        featT = jnp.pad(featT, ((0, 0), (0, n_pad - n)))

    q_in = sent_q
    if use_bf16_matmul:                      # v6e / v7x native MXU dtype,
        q_in = q_in.astype(jnp.bfloat16)     # f32 accumulate in the kernel
        featT = featT.astype(jnp.bfloat16)

    if tb is None:
        # Multiple-of-32 row tiles keep the int8 (32,128) tiling clean and put
        # >= 2 tiles on the "parallel" axis for v7x's two TensorCores; tiny
        # batches use a single full-extent tile.
        if bs >= 64 and bs % 64 == 0:
            tb = bs // 2
        else:
            tb = bs

    grid = (pl.cdiv(bs, tb), n_pad // tn)

    out_shapes = (
        jax.ShapeDtypeStruct((bs, n_pad), jnp.float32),  # raw sim
        jax.ShapeDtypeStruct((bs, n_pad), jnp.int8),     # cts_pred (narrow)
        jax.ShapeDtypeStruct((bs, n_pad), jnp.int8),     # cts_dist (narrow)
        jax.ShapeDtypeStruct((bs, 1), jnp.float32),      # per-row max
    )
    tile_map = lambda i, j: (i, j)
    in_specs = [
        pl.BlockSpec(memory_space=pltpu.MemorySpace.SMEM),   # rank_mean (whole)
        pl.BlockSpec((tb, h), lambda i, j: (i, 0)),          # q row tile
        pl.BlockSpec((h, tn), lambda i, j: (0, j)),          # featT col tile
    ]
    out_specs = (
        pl.BlockSpec((tb, tn), tile_map),
        pl.BlockSpec((tb, tn), tile_map),
        pl.BlockSpec((tb, tn), tile_map),
        pl.BlockSpec((tb, 1), lambda i, j: (i, 0)),          # resident over j
    )

    sim, pred8, dist8, rowmax = pl.pallas_call(
        functools.partial(_ctl_kernel, rank_num, n, n_pad),
        grid=grid,
        out_shape=out_shapes,
        in_specs=in_specs,
        out_specs=out_specs,
        compiler_params=pltpu.CompilerParams(
            dimension_semantics=("parallel", "arbitrary"),
            vmem_limit_bytes=vmem_limit_bytes),   # v5e 16MiB / v7x 32MiB scoped defaults
    )(rank_mean, q_in, featT)

    # Consumer-side finalize (XLA fuses slice + subtract + diag-zero + widen
    # into a single pass over sim).  Padded columns (>= n) hold garbage by
    # construction and are dropped here.
    sim = sim[:, :n]
    logits = sim - rowmax
    row = jnp.arange(bs)[:, None]
    col = jnp.arange(n)[None, :]
    acc = jnp.where(row == col, jnp.float32(0.0), sim)   # torch.scatter diag-zero
    pred = pred8[:, :n].astype(jnp.int32)                # widen for .long() parity
    dist = dist8[:, :n].astype(jnp.int32)
    return logits, pred, dist, acc


# ------------------------------ JAX glue ----------------------------------- #
def encoder_stub(inputs, padding_mask, emb, proj):
    """Deterministic stand-in for the pretrained EMMAEncoder (untranslatable)."""
    e = emb[inputs]                                       # [BS, S, H]
    m = padding_mask[..., None].astype(jnp.float32)       # [BS, S, 1]
    pooled = (e * m).sum(axis=1) / jnp.maximum(m.sum(axis=1), 1.0)
    s = pooled @ proj
    return s / jnp.linalg.norm(s, axis=-1, keepdims=True)


def emma_forward(inputs, params, *, pad_id, rank_num, m_momentum,
                 is_pair=True, use_bf16_matmul=True):
    padding_mask = inputs != pad_id

    # TODO(synk): encoder_q / encoder_k are pretrained HF transformers (+ MLM
    # head) with no Pallas equivalent; replaced by a deterministic stub.
    sent_q = encoder_stub(inputs, padding_mask, params["emb_q"], params["proj_q"])

    # momentum update of the (stub) key encoder, then no-grad key forward
    emb_k = params["emb_k"] * m_momentum + params["emb_q"] * (1.0 - m_momentum)
    proj_k = params["proj_k"] * m_momentum + params["proj_q"] * (1.0 - m_momentum)
    sent_k = jax.lax.stop_gradient(
        encoder_stub(inputs, padding_mask, emb_k, proj_k))

    # Queue is kept persistently transposed [H, K]; featT is a cheap column
    # concat instead of a per-step [K, H] relayout.
    queueT = params["queueT"]                                        # [H, K]
    K = queueT.shape[1]
    featT = jnp.concatenate([sent_k.T, queueT], axis=1)              # [H, BS+K]

    bs = sent_q.shape[0]

    # similarity hot path (matmul + rank map + bucket dist + streaming rowmax)
    logits, pred, dist, acc = emma_ctl_pallas(
        sent_q, featT, params["rank_mean"], rank_num,
        use_bf16_matmul=use_bf16_matmul)

    logits_dict = {"cts": {"logits": logits, "pred": pred, "dist": dist}}
    if is_pair:
        idx = jnp.arange(bs)
        pair_label = jnp.concatenate([idx[bs // 2:], idx[:bs // 2]])
        golden = (idx[:, None] == pair_label[None, :]).astype(jnp.float32)
        golden_mask = jnp.concatenate(
            [golden, jnp.zeros((bs, K), jnp.float32)], axis=1)
        logits_dict["acc"] = {"pred": acc, "label": pair_label}
    else:
        golden_mask = jnp.zeros((bs, bs + K), jnp.float32)
    # cts_label = golden_mask * (rank_num - 1) is independent of sim -> XLA.
    logits_dict["cts"]["label"] = (golden_mask * (rank_num - 1)).astype(jnp.int32)

    # TODO(synk): forward()'s stochastic GMM branch (interploted_feature,
    # gaussian_mixture_module, update_rank_mean EMA buffer) is host-RNG /
    # buffer glue outside this kernel's scope.

    # _dequeue_and_enqueue on the transposed queue (single device:
    # concat_all_gather == identity): column dynamic_update_slice.
    ptr = params["queue_ptr"]
    new_queueT = jax.lax.dynamic_update_slice(queueT, sent_k.T, (0, ptr))
    new_ptr = (ptr + bs) % K
    new_params = dict(params, queueT=new_queueT, queue_ptr=new_ptr,
                      emb_k=emb_k, proj_k=proj_k)
    return logits_dict, new_params


# ------------------------------ reference ---------------------------------- #
def reference(sent_q, all_feature, golden_mask_f32, rank_mean, rank_num):
    sim = sent_q @ all_feature.T
    pred = jnp.argmin(jnp.abs(sim[..., None] - rank_mean[None, None, :]),
                      axis=-1).astype(jnp.int32)
    dist = jnp.floor((sim + 1.0) / 2.0 * rank_num).astype(jnp.int32)
    logits = sim - jnp.max(sim, axis=1, keepdims=True)
    label = (golden_mask_f32 * (rank_num - 1)).astype(jnp.int32)
    bs, n = sim.shape
    mask = 1.0 - (jnp.arange(bs)[:, None] == jnp.arange(n)[None, :]).astype(
        jnp.float32)
    return logits, pred, dist, label, sim * mask


# --------------------------------- main ------------------------------------ #
if __name__ == "__main__":
    BS, SEQ, HID = 8, 16, 64          # batch (even, paired), seq len, hidden
    K, RANK_NUM = 24, 5               # queue size, number of ranks
    VOCAB, PAD_ID = 50, 0
    M_MOMENTUM = 0.999

    key = jax.random.PRNGKey(0)
    k1, k2, k3, k4, k5, k6, k7, k8 = jax.random.split(key, 8)

    queue = jax.random.normal(k1, (K, HID), jnp.float32)
    queue = queue / jnp.linalg.norm(queue, axis=1, keepdims=True)

    params = {
        "emb_q": jax.random.normal(k2, (VOCAB, HID), jnp.float32) * 0.1,
        "proj_q": jax.random.normal(k3, (HID, HID), jnp.float32) * 0.1,
        "emb_k": jax.random.normal(k4, (VOCAB, HID), jnp.float32) * 0.1,
        "proj_k": jax.random.normal(k5, (HID, HID), jnp.float32) * 0.1,
        "queueT": queue.T,                                   # persistent [H, K]
        "queue_ptr": jnp.int32(0),
        "rank_mean": jnp.zeros((RANK_NUM,), jnp.float32),    # buffer init (zeros)
        # parameters present in __init__ but unused by this hot path:
        "mu": jax.random.normal(k6, (RANK_NUM, HID), jnp.float32),
        "lg_sigma2": jax.random.normal(k7, (RANK_NUM, HID), jnp.float32),
        "pi": jnp.ones((RANK_NUM,), jnp.float32),
    }

    inputs = jax.random.randint(k8, (BS, SEQ), 0, VOCAB, dtype=jnp.int32)

    # ---- strict f32-path forward (parity test path) -------------------------
    logits_dict, new_params = emma_forward(
        inputs, params, pad_id=PAD_ID, rank_num=RANK_NUM,
        m_momentum=M_MOMENTUM, is_pair=True, use_bf16_matmul=False)
    jax.block_until_ready(logits_dict)

    # ---- correctness (f32 path) against a pure-JAX reference ---------------
    padding_mask = inputs != PAD_ID
    sent_q = encoder_stub(inputs, padding_mask, params["emb_q"], params["proj_q"])
    emb_k = params["emb_k"] * M_MOMENTUM + params["emb_q"] * (1 - M_MOMENTUM)
    proj_k = params["proj_k"] * M_MOMENTUM + params["proj_q"] * (1 - M_MOMENTUM)
    sent_k = encoder_stub(inputs, padding_mask, emb_k, proj_k)
    all_feature = jnp.concatenate([sent_k, params["queueT"].T], axis=0)
    idx = jnp.arange(BS)
    pair_label = jnp.concatenate([idx[BS // 2:], idx[:BS // 2]])
    gmask = jnp.concatenate(
        [(idx[:, None] == pair_label[None, :]).astype(jnp.float32),
         jnp.zeros((BS, K), jnp.float32)], axis=1)
    ref = reference(sent_q, all_feature, gmask, params["rank_mean"], RANK_NUM)

    got = (logits_dict["cts"]["logits"], logits_dict["cts"]["pred"],
           logits_dict["cts"]["dist"], logits_dict["cts"]["label"],
           logits_dict["acc"]["pred"])
    for g, r in zip(got, ref):
        assert g.shape == r.shape and g.dtype == r.dtype
        assert jnp.allclose(g.astype(jnp.float32), r.astype(jnp.float32),
                            atol=1e-5, rtol=1e-5)

    # ---- trained-state rank_mean exercises the peeled argmin loop ----------
    featT_test = jnp.concatenate([sent_k.T, params["queueT"]], axis=1)
    rank_mean_trained = jnp.array([-0.8, -0.4, 0.0, 0.4, 0.8], jnp.float32)
    lg2, pr2, ds2, ac2 = emma_ctl_pallas(
        sent_q, featT_test, rank_mean_trained, RANK_NUM, use_bf16_matmul=False)
    ref2 = reference(sent_q, all_feature, gmask, rank_mean_trained, RANK_NUM)
    assert jnp.allclose(lg2, ref2[0], atol=1e-5, rtol=1e-5)
    # tolerate rare bucket-boundary flips from matmul reassociation
    assert jnp.mean((pr2 == ref2[1]).astype(jnp.float32)) >= 0.99

    # ---- default bf16 MXU path (v6e/v7x), loose parity ----------------------
    lgb, prb, dsb, acb = emma_ctl_pallas(
        sent_q, featT_test, params["rank_mean"], RANK_NUM)   # bf16 default
    jax.block_until_ready(lgb)
    assert jnp.allclose(lgb, got[0], atol=5e-2)

    print("KERNEL_OK")
</pallas_src>

<mosaic_0001>
module attributes {stable_mosaic.version = 11 : i64} {
  func.func @_ctl_kernel(%arg0: i32, %arg1: i32, %arg2: memref<5xf32, #tpu.memory_space<smem>>, %arg3: memref<8x64xf32, #tpu.memory_space<vmem>>, %arg4: memref<64x128xf32, #tpu.memory_space<vmem>>, %arg5: memref<8x128xf32, #tpu.memory_space<vmem>>, %arg6: memref<8x128xi8, #tpu.memory_space<vmem>>, %arg7: memref<8x128xi8, #tpu.memory_space<vmem>>, %arg8: memref<8x1xf32, #tpu.memory_space<vmem>>) attributes {dimension_semantics = [#tpu.dimension_semantics<parallel>, #tpu.dimension_semantics<arbitrary>], iteration_bounds = array<i64: 1, 1>, scalar_prefetch = 0 : i64, scratch_operands = 0 : i64, tpu.core_type = #tpu.core_type<tc>, window_params = [{transform_indices = @transform_0, window_bounds = array<i64: 5>}, {transform_indices = @transform_1, window_bounds = array<i64: 8, 64>}, {transform_indices = @transform_2, window_bounds = array<i64: 64, 128>}, {transform_indices = @transform_3, window_bounds = array<i64: 8, 128>}, {transform_indices = @transform_4, window_bounds = array<i64: 8, 128>}, {transform_indices = @transform_5, window_bounds = array<i64: 8, 128>}, {transform_indices = @transform_6, window_bounds = array<i64: 8, 1>}]} {
    %c0 = arith.constant 0 : index
    %c0_0 = arith.constant 0 : index
    %0 = vector.load %arg3[%c0, %c0_0] : memref<8x64xf32, #tpu.memory_space<vmem>>, vector<8x64xf32>
    %c0_1 = arith.constant 0 : index
    %c0_2 = arith.constant 0 : index
    %1 = vector.load %arg4[%c0_1, %c0_2] : memref<64x128xf32, #tpu.memory_space<vmem>>, vector<64x128xf32>
    %cst = arith.constant dense<0.000000e+00> : vector<8x128xf32>
    %2 = tpu.matmul %0, %1, %cst {dimension_numbers = #tpu.dot_dimension_numbers<[1], [0], [0], [1], [0, 0, 1, 1], [], []>} : vector<8x64xf32>, vector<64x128xf32>, vector<8x128xf32> -> vector<8x128xf32>
    %c0_3 = arith.constant 0 : index
    %c0_4 = arith.constant 0 : index
    %3 = vector.load %arg5[%c0_3, %c0_4] : memref<8x128xf32, #tpu.memory_space<vmem>>, vector<8x128xf32>
    tpu.vector_store %arg5[%c0_3, %c0_4], %2 {strides = array<i32>} : memref<8x128xf32, #tpu.memory_space<vmem>>, vector<8x128xf32>,
    %c0_i32 = arith.constant 0 : i32
    %4 = arith.cmpi eq, %arg1, %c0_i32 : i32
    %5 = arith.extui %4 : i1 to i32
    %c0_i32_5 = arith.constant 0 : i32
    %6 = arith.cmpi ne, %5, %c0_i32_5 : i32
    scf.if %6 {
      %cst_18 = arith.constant 0xFF800000 : f32
      %59 = vector.broadcast %cst_18 : f32 to vector<8x1xf32>
      %c0_19 = arith.constant 0 : index
      %c0_20 = arith.constant 0 : index
      %60 = vector.load %arg8[%c0_19, %c0_20] : memref<8x1xf32, #tpu.memory_space<vmem>>, vector<8x1xf32>
      tpu.vector_store %arg8[%c0_19, %c0_20], %59 {strides = array<i32>} : memref<8x1xf32, #tpu.memory_space<vmem>>, vector<8x1xf32>,
    } else {
    }
    %c0_i32_6 = arith.constant 0 : i32
    %7 = arith.cmpi eq, %arg1, %c0_i32_6 : i32
    %8 = arith.extui %7 : i1 to i32
    %c0_i32_7 = arith.constant 0 : i32
    %9 = arith.cmpi ne, %8, %c0_i32_7 : i32
    scf.if %9 {
      %59 = tpu.iota {dimensions = array<i32: 1>} : vector<8x128xi32>
      %c128_i32 = arith.constant 128 : i32
      %60 = arith.muli %arg1, %c128_i32 : i32
      %61 = vector.broadcast %60 : i32 to vector<8x128xi32>
      %62 = arith.addi %59, %61 : vector<8x128xi32>
      %c32_i32 = arith.constant 32 : i32
      %63 = vector.broadcast %c32_i32 : i32 to vector<8x128xi32>
      %64 = arith.cmpi slt, %62, %63 : vector<8x128xi32>
      %cst_18 = arith.constant 0xFF800000 : f32
      %65 = vector.broadcast %cst_18 : f32 to vector<8x128xf32>
      %66 = arith.select %64, %2, %65 : vector<8x128xi1>, vector<8x128xf32>
      %c0_19 = arith.constant 0 : index
      %c0_20 = arith.constant 0 : index
      %67 = vector.load %arg8[%c0_19, %c0_20] : memref<8x1xf32, #tpu.memory_space<vmem>>, vector<8x1xf32>
      %cst_21 = arith.constant dense<0xFF800000> : vector<8xf32>
      %68 = vector.multi_reduction <maximumf>, %66, %cst_21 [1] : vector<8x128xf32> to vector<8xf32>
      %69 = vector.shape_cast %68 : vector<8xf32> to vector<8x1xf32>
      %70 = arith.maximumf %67, %69 : vector<8x1xf32>
      %c0_22 = arith.constant 0 : index
      %c0_23 = arith.constant 0 : index
      %71 = vector.load %arg8[%c0_22, %c0_23] : memref<8x1xf32, #tpu.memory_space<vmem>>, vector<8x1xf32>
      tpu.vector_store %arg8[%c0_22, %c0_23], %70 {strides = array<i32>} : memref<8x1xf32, #tpu.memory_space<vmem>>, vector<8x1xf32>,
    } else {
    }
    %c0_i32_8 = arith.constant 0 : i32
    %10 = arith.cmpi ne, %arg1, %c0_i32_8 : i32
    %11 = arith.extui %10 : i1 to i32
    %c0_i32_9 = arith.constant 0 : i32
    %12 = arith.cmpi ne, %11, %c0_i32_9 : i32
    scf.if %12 {
      %c0_18 = arith.constant 0 : index
      %c0_19 = arith.constant 0 : index
      %59 = vector.load %arg8[%c0_18, %c0_19] : memref<8x1xf32, #tpu.memory_space<vmem>>, vector<8x1xf32>
      %cst_20 = arith.constant dense<0xFF800000> : vector<8xf32>
      %60 = vector.multi_reduction <maximumf>, %2, %cst_20 [1] : vector<8x128xf32> to vector<8xf32>
      %61 = vector.shape_cast %60 : vector<8xf32> to vector<8x1xf32>
      %62 = arith.maximumf %59, %61 : vector<8x1xf32>
      %c0_21 = arith.constant 0 : index
      %c0_22 = arith.constant 0 : index
      %63 = vector.load %arg8[%c0_21, %c0_22] : memref<8x1xf32, #tpu.memory_space<vmem>>, vector<8x1xf32>
      tpu.vector_store %arg8[%c0_21, %c0_22], %62 {strides = array<i32>} : memref<8x1xf32, #tpu.memory_space<vmem>>, vector<8x1xf32>,
    } else {
    }
    %c0_10 = arith.constant 0 : index
    %13 = memref.load %arg2[%c0_10] : memref<5xf32, #tpu.memory_space<smem>>
    %14 = vector.broadcast %13 : f32 to vector<8x128xf32>
    %15 = arith.subf %2, %14 : vector<8x128xf32>
    %16 = math.absf %15 : vector<8x128xf32>
    %c0_i32_11 = arith.constant 0 : i32
    %17 = vector.broadcast %c0_i32_11 : i32 to vector<8x128xi32>
    %c1 = arith.constant 1 : index
    %18 = memref.load %arg2[%c1] : memref<5xf32, #tpu.memory_space<smem>>
    %19 = vector.broadcast %18 : f32 to vector<8x128xf32>
    %20 = arith.subf %2, %19 : vector<8x128xf32>
    %21 = math.absf %20 : vector<8x128xf32>
    %22 = arith.cmpf olt, %21, %16 : vector<8x128xf32>
    %c1_i32 = arith.constant 1 : i32
    %23 = vector.broadcast %c1_i32 : i32 to vector<8x128xi32>
    %24 = arith.select %22, %23, %17 : vector<8x128xi1>, vector<8x128xi32>
    %25 = arith.minimumf %16, %21 : vector<8x128xf32>
    %c2 = arith.constant 2 : index
    %26 = memref.load %arg2[%c2] : memref<5xf32, #tpu.memory_space<smem>>
    %27 = vector.broadcast %26 : f32 to vector<8x128xf32>
    %28 = arith.subf %2, %27 : vector<8x128xf32>
    %29 = math.absf %28 : vector<8x128xf32>
    %30 = arith.cmpf olt, %29, %25 : vector<8x128xf32>
    %c2_i32 = arith.constant 2 : i32
    %31 = vector.broadcast %c2_i32 : i32 to vector<8x128xi32>
    %32 = arith.select %30, %31, %24 : vector<8x128xi1>, vector<8x128xi32>
    %33 = arith.minimumf %25, %29 : vector<8x128xf32>
    %c3 = arith.constant 3 : index
    %34 = memref.load %arg2[%c3] : memref<5xf32, #tpu.memory_space<smem>>
    %35 = vector.broadcast %34 : f32 to vector<8x128xf32>
    %36 = arith.subf %2, %35 : vector<8x128xf32>
    %37 = math.absf %36 : vector<8x128xf32>
    %38 = arith.cmpf olt, %37, %33 : vector<8x128xf32>
    %c3_i32 = arith.constant 3 : i32
    %39 = vector.broadcast %c3_i32 : i32 to vector<8x128xi32>
    %40 = arith.select %38, %39, %32 : vector<8x128xi1>, vector<8x128xi32>
    %41 = arith.minimumf %33, %37 : vector<8x128xf32>
    %c4 = arith.constant 4 : index
    %42 = memref.load %arg2[%c4] : memref<5xf32, #tpu.memory_space<smem>>
    %43 = vector.broadcast %42 : f32 to vector<8x128xf32>
    %44 = arith.subf %2, %43 : vector<8x128xf32>
    %45 = math.absf %44 : vector<8x128xf32>
    %46 = arith.cmpf olt, %45, %41 : vector<8x128xf32>
    %c4_i32 = arith.constant 4 : i32
    %47 = vector.broadcast %c4_i32 : i32 to vector<8x128xi32>
    %48 = arith.select %46, %47, %40 : vector<8x128xi1>, vector<8x128xi32>
    %49 = arith.trunci %48 : vector<8x128xi32> to vector<8x128xi8>
    %c0_12 = arith.constant 0 : index
    %c0_13 = arith.constant 0 : index
    %50 = vector.load %arg6[%c0_12, %c0_13] : memref<8x128xi8, #tpu.memory_space<vmem>>, vector<8x128xi8>
    tpu.vector_store %arg6[%c0_12, %c0_13], %49 {strides = array<i32>} : memref<8x128xi8, #tpu.memory_space<vmem>>, vector<8x128xi8>,
    %cst_14 = arith.constant 2.500000e+00 : f32
    %51 = vector.broadcast %cst_14 : f32 to vector<8x128xf32>
    %52 = arith.mulf %2, %51 : vector<8x128xf32>
    %cst_15 = arith.constant 2.500000e+00 : f32
    %53 = vector.broadcast %cst_15 : f32 to vector<8x128xf32>
    %54 = arith.addf %52, %53 : vector<8x128xf32>
    %55 = math.floor %54 : vector<8x128xf32>
    %56 = arith.fptosi %55 : vector<8x128xf32> to vector<8x128xi32>
    %57 = arith.trunci %56 : vector<8x128xi32> to vector<8x128xi8>
    %c0_16 = arith.constant 0 : index
    %c0_17 = arith.constant 0 : index
    %58 = vector.load %arg7[%c0_16, %c0_17] : memref<8x128xi8, #tpu.memory_space<vmem>>, vector<8x128xi8>
    tpu.vector_store %arg7[%c0_16, %c0_17], %57 {strides = array<i32>} : memref<8x128xi8, #tpu.memory_space<vmem>>, vector<8x128xi8>,
    return
  }
  func.func @transform_0(%arg0: i32, %arg1: i32) -> i32 {
    %c0_i32 = arith.constant 0 : i32
    %c0_i32_0 = arith.constant 0 : i32
    return %c0_i32 : i32
  }
  func.func @transform_1(%arg0: i32, %arg1: i32) -> (i32, i32) {
    %c0_i32 = arith.constant 0 : i32
    %c0_i32_0 = arith.constant 0 : i32
    return %arg0, %c0_i32 : i32, i32
  }
  func.func @transform_2(%arg0: i32, %arg1: i32) -> (i32, i32) {
    %c0_i32 = arith.constant 0 : i32
    %c0_i32_0 = arith.constant 0 : i32
    return %c0_i32, %arg1 : i32, i32
  }
  func.func @transform_3(%arg0: i32, %arg1: i32) -> (i32, i32) {
    %c0_i32 = arith.constant 0 : i32
    return %arg0, %arg1 : i32, i32
  }
  func.func @transform_4(%arg0: i32, %arg1: i32) -> (i32, i32) {
    %c0_i32 = arith.constant 0 : i32
    return %arg0, %arg1 : i32, i32
  }
  func.func @transform_5(%arg0: i32, %arg1: i32) -> (i32, i32) {
    %c0_i32 = arith.constant 0 : i32
    return %arg0, %arg1 : i32, i32
  }
  func.func @transform_6(%arg0: i32, %arg1: i32) -> (i32, i32) {
    %c0_i32 = arith.constant 0 : i32
    %c0_i32_0 = arith.constant 0 : i32
    return %arg0, %c0_i32 : i32, i32
  }
}

</mosaic_0001>

<bundles_post_ra>
// kernel: tpu_custom_call.1
= control target key start
LH: loop header
LB: loop body
LE: loop exit
PB: predicated region body
PF: predicated region fallthrough
CT: control target
= control target key end

     0   :  { %12 = vsyncpa [#allocation5], 0  ;;  %s499_s0 = inlined_call_operand.hbm [shape: f32[5], index: 0, kind: input, shape index: {}]   ;;  %s500_s1 = inlined_call_operand.hbm [shape: f32[8,64], index: 1, kind: input, shape index: {}]   ;;  %s501_s2 = inlined_call_operand.hbm [shape: f32[64,128], index: 2, kind: input, shape index: {}]   ;;  %s502_s3 = inlined_call_operand.hbm [shape: f32[8,128], index: 3, kind: output, shape index: {0}]   ;;  %s503_s4 = inlined_call_operand.hbm [shape: s8[8,128], index: 4, kind: output, shape index: {1}]   ;;  %s504_s5 = inlined_call_operand.hbm [shape: s8[8,128], index: 5, kind: output, shape index: {2}]   ;;  %s505_s6 = inlined_call_operand.vmem [shape: f32[8,1], index: 6, kind: output, shape index: {3}]  }
   0x1   :  { %13 = vsyncpa [#allocation3], 0 }
   0x2   :  { %14 = vsyncpa [#allocation8], 0 }
   0x3   :  { %15 = vsyncpa [#allocation4], 0 }
   0x4   :  { %16 = vsyncpa [#allocation11], 0  ;;  %s423_s21 = smov [#allocation2]   ;;  %s424_s24 = smov [#allocation6]  }
   0x5   :  { %24 = dma.hbm_to_smem %s499_s0, 16, %s423_s21, [#allocation5]  }
   0x6   :  { %s31_s25 = sshll.u32 %s424_s24, 4  ;;  %s425_s26 = smov [#allocation7]   ;;  %s32_s25 = int_to_ptr.vmem [resolvable:$true] %s31_s25 }
   0x7   :  { %s40_s27 = sshll.u32 %s425_s26, 4  ;;  %s321_s28 = scalar_lea.vmem %s32_s25, 128  ;;  %s41_s27 = int_to_ptr.vmem [resolvable:$true] %s40_s27 }
   0x8   :  { %p322_p0 = scmp.ne.s32.totalorder %s32_s25, %s321_s28  ;;  %p326_p1 = scmp.lt.s32.totalorder %s32_s25, %s32_s25 }
   0x9   :  { %p327_p2 = scmp.lt.s32.totalorder %s321_s28, %s321_s28 }
   0xb   :  { %p328_p3 = por %p327_p2, %p326_p1 }
   0xd   :  { %p329_p4 = pnand %p328_p3, %p322_p0 }
   0xf   :  { %332 = shalt.err (!%p329_p4)
}
  0x10   :  { %34 = dma.hbm_to_vmem [thread:$0]  %s500_s1, 128, %s32_s25, [#allocation3]  }
  0x11   :  { %s341_s7 = scalar_lea.vmem %s41_s27, 1024  ;;  %p346_p6 = scmp.lt.s32.totalorder %s41_s27, %s41_s27 }
  0x12   :  { %p342_p5 = scmp.ne.s32.totalorder %s41_s27, %s341_s7  ;;  %p347_p7 = scmp.lt.s32.totalorder %s341_s7, %s341_s7 }
  0x14   :  { %p348_p8 = por %p347_p7, %p346_p6 }
  0x16   :  { %p349_p9 = pnand %p348_p8, %p342_p5 }
  0x18   :  { %352 = shalt.err (!%p349_p9)
}
  0x19   :  { %s426_s0 = smov 128   ;;  %s427_s8 = smov 8  }
  0x1a   :  { %46 = dma.hbm_to_vmem [thread:$0]  %s501_s2, 1024, %s41_s27, [#allocation8], %s426_s0, %s426_s0, %s427_s8  }
  0x1b   :  { %413 = dma.done.wait [#allocation5], 16  }
  0x1c   :  { %414 = vsyncadd [#allocation5], 4294967280 }
  0x1d   :  { %415 = dma.done.wait [#allocation3], 128  }
  0x1e   :  { %416 = vsyncadd [#allocation3], 4294967168 }
  0x1f   :  { %417 = dma.done.wait [#allocation8], 1024  }
  0x20   :  { %418 = vsyncadd [#allocation8], 4294966272 }
  0x21   :  { %56 = sfence }
  0x22   :  { %v65_v0 = vld [vmem:[#allocation7 + $0x38] sm:$0xff]  ;;  %v428_v1 = vmov 0.0   ;;  %v64_v2 = vld [vmem:[#allocation7 + $0x30] sm:$0xff]  ;;  %vm429_vm0 = vmmov 0   ;;  %v63_v3 = vld [vmem:[#allocation7 + $0x28] sm:$0xff]  ;;  %vm66_vm1 = vcmask 523264   ;;  %v147_v11 = vlaneseq }
  0x23   :  { %272 = vmatprep.subr.mxu0 %v428_v1  ;;  %288 = vmatprep.mubr.msk.f32.mxu0 %vm429_vm0, %v428_v1  ;;  %v62_v4 = vld [vmem:[#allocation7 + $0x20] sm:$0xff]  ;;  %v61_v5 = vld [vmem:[#allocation7 + $0x18] sm:$0xff]  ;;  %v60_v6 = vld [vmem:[#allocation7 + $0x10] sm:$0xff]  ;;  %vm145_vm2 = vcmask 7168   ;;  %v430_v10 = vmov -inf   ;;  %s169_s11 = sld [smem:[#allocation2]] }
  0x24   :  { %273 = vmatpush3.msra.mxu0 %v65_v0  ;;  %v59_v7 = vld [vmem:[#allocation7 + $0x8] sm:$0xff]  ;;  %v58_v8 = vld [vmem:[#allocation7] sm:$0xff]  ;;  %v57_v9 = vld [vmem:[#allocation6] sm:$0xff]  ;;  %146 = vst.msk [vmem:[%s505_s6] sm:$0xff] %vm145_vm2, %v430_v10  ;;  %s259_s12 = sld [smem:[#allocation2 + $0x1]]  ;;  %v148_v12 = vand.u32 127, %v147_v11 }
  0x25   :  { %274 = vmatprep.subr.mxu0 %v428_v1  ;;  %s260_s13 = sld [smem:[#allocation2 + $0x2]]  ;;  %v431_v32 = vmov 0   ;;  %s432_s16 = smov [#allocation10]  }
  0x26   :  { %275 = vmatpush3.msra.mxu0 %v64_v2  ;;  %s261_s14 = sld [smem:[#allocation2 + $0x3]]  ;;  %vm152_vm3 = vcmp.lt.s32.totalorder %v148_v12, 32  ;;  %s226_s17 = sshll.u32 %s432_s16, 4  ;;  %s227_s17 = int_to_ptr.vmem [resolvable:$true] %s226_s17 }
  0x27   :  { %276 = vmatprep.subr.mxu0 %v428_v1  ;;  %s262_s15 = sld [smem:[#allocation2 + $0x4]]  ;;  %s433_s18 = smov [#allocation9]  }
  0x28   :  { %277 = vmatpush3.msra.mxu0 %v63_v3  ;;  %s216_s19 = sshll.u32 %s433_s18, 4  ;;  %s217_s19 = int_to_ptr.vmem [resolvable:$true] %s216_s19 }
  0x29   :  { %278 = vmatprep.subr.mxu0 %v428_v1  ;;  %v170_v13 = vstv %s169_s11  ;;  %s353_s20 = scalar_lea.vmem %s217_s19, 128  ;;  %p358_p11 = scmp.lt.s32.totalorder %s217_s19, %s217_s19 }
  0x2a   :  { %279 = vmatpush3.msra.mxu0 %v62_v4  ;;  %v174_v14 = vstv %s259_s12  ;;  %p354_p10 = scmp.ne.s32.totalorder %s217_s19, %s353_s20  ;;  %p359_p12 = scmp.lt.s32.totalorder %s353_s20, %s353_s20 }
  0x2b   :  { %280 = vmatprep.subr.mxu0 %v428_v1  ;;  %v181_v15 = vstv %s260_s13 }
  0x2c   :  { %281 = vmatpush3.msra.mxu0 %v61_v5  ;;  %v188_v17 = vstv %s261_s14  ;;  %p360_p13 = por %p359_p12, %p358_p11 }
  0x2d   :  { %282 = vmatprep.subr.mxu0 %v428_v1  ;;  %v195_v23 = vstv %s262_s15 }
  0x2e   :  { %283 = vmatpush3.msra.mxu0 %v60_v6  ;;  %p361_p0 = pnand %p360_p13, %p354_p10 }
  0x2f   :  { %284 = vmatprep.subr.mxu0 %v428_v1 }
  0x30   :  { %285 = vmatpush3.msra.mxu0 %v59_v7 }
  0x31   :  { %286 = vmatprep.subr.mxu0 %v428_v1 }
  0x32   :  { %287 = vmatpush3.msra.mxu0 %v58_v8 }
  0x33   :  { %289 = vmatmul.mubr.msk.f32.vlgmr.msra.gmra.mxu0 %vm66_vm1, %v57_v9 }
  0xf3   :  { %v136_v16 = vpop.f32.mrf.mxu0 }
  0xf4   :  { %140 = vst [vmem:[#allocation9] sm:$0xff] %v136_v16  ;;  %v153_v18 = vsel %vm152_vm3, %v136_v16, -inf  ;;  %v171_v19 = vsub.f32 %v136_v16, %v170_v13  ;;  %v175_v20 = vsub.f32 %v136_v16, %v174_v14  ;;  %v182_v21 = vsub.f32 %v136_v16, %v181_v15 }
  0xf5   :  { %v290_v22 = vpop.f32.mrf.mxu0  ;;  %155 = vmax.xlane.f32.xlu0 %v153_v18  ;;  %v203_v24 = vmul.f32 2.5, %v136_v16  ;;  %v189_v27 = vsub.f32 %v136_v16, %v188_v17  ;;  %v196_v31 = vsub.f32 %v136_v16, %v195_v23 }
  0xf6   :  { %v172_v25 = vand.u32 2147483647, %v171_v19  ;;  %v176_v26 = vand.u32 2147483647, %v175_v20  ;;  %v183_v30 = vand.u32 2147483647, %v182_v21 }
  0xf7   :  { %v204_v28 = vadd.f32 2.5, %v203_v24  ;;  %v190_v36 = vand.u32 2147483647, %v189_v27  ;;  %v197_v40 = vand.u32 2147483647, %v196_v31 }
  0xf8   :  { %vm177_vm4 = vcmp.lt.f32.partialorder %v176_v26, %v172_v25  ;;  %v179_v29 = vmin.f32 %v172_v25, %v176_v26 }
  0xf9   :  { %v178_v33 = vsel %vm177_vm4, 1, %v431_v32  ;;  %v205_v34 = vfloor.f32 %v204_v28 }
  0xfa   :  { %vm184_vm5 = vcmp.lt.f32.partialorder %v183_v30, %v179_v29  ;;  %v186_v35 = vmin.f32 %v179_v29, %v183_v30 }
  0xfb   :  { %v185_v37 = vsel %vm184_vm5, 2, %v178_v33  ;;  %v291_v38 = vtrunc.f32 %v205_v34 }
  0xfc   :  { %vm191_vm6 = vcmp.lt.f32.partialorder %v190_v36, %v186_v35  ;;  %v193_v39 = vmin.f32 %v186_v35, %v190_v36 }
  0xfd   :  { %v192_v41 = vsel %vm191_vm6, 3, %v185_v37  ;;  %v292_v42 = vcvt.f32.s32 %v291_v38 }
  0xfe   :  { %vm198_vm7 = vcmp.lt.f32.partialorder %v197_v40, %v193_v39 }
  0xff   :  { %v199_v43 = vsel %vm198_vm7, 4, %v192_v41  ;;  %v207_v44 = vpack.c.b16 %v292_v42, %v292_v42 }
 0x100   :  { %v200_v45 = vpack.c.b16 %v199_v43, %v199_v43 }
 0x101   :  { %v208_v46 = vpack.c.b8 %v207_v44, %v207_v44 }
 0x102   :  { %v201_v47 = vpack.c.b8 %v200_v45, %v200_v45 }
 0x103   :  { %364 = shalt.err (!%p361_p0)
}
 0x104   :  { %219 = dma.vmem_to_hbm [thread:$0]  %s217_s19, 128, %s502_s3, [#allocation4]   ;;  %209 = vst [vmem:[#allocation12] sm:$0x3] %v208_v46  ;;  %202 = vst [vmem:[#allocation10] sm:$0x3] %v201_v47 }
 0x105   :  { %s434_s23 = smov [#allocation12]   ;;  %s373_s25 = scalar_lea.vmem %s227_s17, 32 }
 0x106   :  { %s236_s24 = sshll.u32 %s434_s23, 4  ;;  %p374_p1 = scmp.ne.s32.totalorder %s227_s17, %s373_s25  ;;  %s237_s24 = int_to_ptr.vmem [resolvable:$true] %s236_s24 }
 0x107   :  { %p378_p2 = scmp.lt.s32.totalorder %s227_s17, %s227_s17  ;;  %p379_p3 = scmp.lt.s32.totalorder %s373_s25, %s373_s25 }
 0x109   :  { %p380_p4 = por %p379_p3, %p378_p2 }
 0x10b   :  { %p381_p5 = pnand %p380_p4, %p374_p1 }
 0x10d   :  { %384 = shalt.err (!%p381_p5)
}
 0x10e   :  { %229 = dma.vmem_to_hbm [thread:$0]  %s227_s17, 32, %s503_s4, [#allocation11]  }
 0x10f   :  { %s393_s28 = scalar_lea.vmem %s237_s24, 32  ;;  %p398_p7 = scmp.lt.s32.totalorder %s237_s24, %s237_s24 }
 0x110   :  { %p394_p6 = scmp.ne.s32.totalorder %s237_s24, %s393_s28  ;;  %p399_p8 = scmp.lt.s32.totalorder %s393_s28, %s393_s28 }
 0x112   :  { %p400_p9 = por %p399_p8, %p398_p7 }
 0x114   :  { %p401_p10 = pnand %p400_p9, %p394_p6 }
 0x116   :  { %404 = shalt.err (!%p401_p10)
}
 0x117   :  { %239 = dma.vmem_to_hbm [thread:$0]  %s237_s24, 32, %s504_s5, [#allocation11]   ;;  %v154_v48 = vld [vmem:[%s505_s6] sm:$0xff] }
 0x17e   :  { %v156_v49 = vpop.xlane.xlu0 %155 }
 0x17f   :  { %v157_v50 = vmax.f32 %v154_v48, %v156_v49 }
 0x181   :  { %158 = vst.msk [vmem:[%s505_s6] sm:$0xff] %vm145_vm2, %v157_v50 }
 0x182   :  { %419 = dma.done.wait [#allocation4], 128  }
 0x183   :  { %420 = vsyncadd [#allocation4], 4294967168 }
 0x184   :  { %421 = dma.done.wait [#allocation11], 64  }
 0x185   :  { %422 = vsyncadd [#allocation11], 4294967232 }
 0x186   :  { %253 = vsyncpa [#allocation3], 1 }
 0x187   :  { %254 = vsyncpa [#allocation8], 1 }
 0x188   :  { %255 = vsyncpa [#allocation4], 1 }
 0x189   :  { %256 = vsyncpa [#allocation11], 1 }
 0x18a   :  { %257 = vsyncpa [#allocation5], 1 }

</bundles_post_ra>
